<compile_context>
chip_gen: v7x
topology: tpu7x:2x2x1
jax: 0.10.0
libtpu: 0.0.40
codegen_flags: <defaults>
</compile_context>

<pallas_src>
import functools

import jax
import jax.numpy as jnp
from jax.experimental import pallas as pl
from jax.experimental.pallas import tpu as pltpu


def tarcomm_fused_kernel(x_ref, w_ref, b_ref, msg_ref, sig_ref, qry_ref):
    """One fused MXU matmul for all three heads; exact-width per-head stores."""
    E = msg_ref.shape[-1]
    S = sig_ref.shape[-1]
    # In-kernel cast to the matmul dtype (free VPU work; avoids a wrapper-side
    # astype pass + extra HBM traffic over x).  No-op when compute is f32.
    x = x_ref[...].astype(w_ref.dtype)
    acc = jnp.dot(x, w_ref[...], preferred_element_type=jnp.float32)
    acc = acc + b_ref[...]                       # f32 bias add on the VPU
    msg_ref[...] = acc[:, :E].astype(msg_ref.dtype)
    sig_ref[...] = acc[:, E:E + S].astype(sig_ref.dtype)
    qry_ref[...] = acc[:, E + S:E + 2 * S].astype(qry_ref.dtype)


def prepare_tar_comm_params(wv, bv, ws, bs, wq, bq, *,
                            compute_dtype=jnp.bfloat16):
    """One-time (init-time) fusion of the three Linear heads.

    wv: [D, E], ws/wq: [D, S]; biases are [1, *].
    Returns (w_fused [D, E+2S] in compute_dtype, b_fused [1, E+2S] f32, E, S).
    """
    E = wv.shape[1]
    S = ws.shape[1]
    w = jnp.concatenate([wv, ws, wq], axis=1).astype(compute_dtype)
    b = jnp.concatenate([bv, bs, bq], axis=1).astype(jnp.float32)
    return w, b, E, S


def tar_comm_forward(x, w_fused, b_fused, *, E, S, tm=1024,
                     out_dtype=jnp.float32):
    """TarComm forward with pre-fused params.

    x:       [B, D]   (D = input_shape + rnn_hidden_dim)
    w_fused: [D, E+2S] (compute dtype), b_fused: [1, E+2S] (f32)
    Returns (message [B, E], signature [B, S], query [B, S]) in out_dtype.
    """
    B, D = x.shape
    N = w_fused.shape[1]
    assert N == E + 2 * S, "fused weight width must equal E + 2*S"

    w_isize = jnp.dtype(w_fused.dtype).itemsize
    x_isize = jnp.dtype(x.dtype).itemsize
    out_isize = jnp.dtype(out_dtype).itemsize
    rowpack = 16 if w_isize < 4 else 8       # bf16 packs 16 rows / vreg group

    # Row tile: as large as possible (per-grid-step overhead ~0.35 us), but
    # capped so the "parallel" grid has >= 2 steps once B is large enough
    # (v7x has 2 TensorCores; a 1-step grid idles the second one).
    full_rows = pl.cdiv(B, rowpack) * rowpack
    if B >= 2 * rowpack:
        cap = pl.cdiv(pl.cdiv(B, 2), rowpack) * rowpack
    else:
        cap = full_rows
    tm_eff = max(rowpack, min(tm, cap))
    b_pad = pl.cdiv(B, tm_eff) * tm_eff

    x_k = x
    if b_pad != B:
        x_k = jnp.pad(x_k, ((0, b_pad - B), (0, 0)))
    grid = (b_pad // tm_eff,)

    # Advisory cost hint so XLA schedules this sub-microsecond call sensibly.
    bytes_accessed = (b_pad * D * x_isize            # x read
                      + D * N * w_isize + N * 4      # resident weight + bias
                      + b_pad * N * out_isize)       # three head outputs
    cost = pl.CostEstimate(flops=2 * b_pad * D * N,
                           bytes_accessed=bytes_accessed,
                           transcendentals=0)

    # Explicit VMEM budget: double-buffered x/out tiles + resident weights +
    # headroom; kept well under v7x's 64 MiB physical VMEM.
    vmem_need = (2 * (tm_eff * D * x_isize + tm_eff * N * out_isize)
                 + D * N * w_isize + N * 4 + tm_eff * N * 4)
    vmem_limit = int(min(32 << 20, max(4 << 20, 4 * vmem_need)))

    msg, sig, qry = pl.pallas_call(
        tarcomm_fused_kernel,
        out_shape=(jax.ShapeDtypeStruct((b_pad, E), out_dtype),
                   jax.ShapeDtypeStruct((b_pad, S), out_dtype),
                   jax.ShapeDtypeStruct((b_pad, S), out_dtype)),
        grid=grid,
        in_specs=[
            # x tiles stream over rows (software-pipelined HBM->VMEM).
            pl.BlockSpec((tm_eff, D), lambda i: (i, 0)),
            # Fused weight + bias stay VMEM-resident across all row tiles.
            pl.BlockSpec((D, N), lambda i: (0, 0)),
            pl.BlockSpec((1, N), lambda i: (0, 0)),
        ],
        out_specs=(
            pl.BlockSpec((tm_eff, E), lambda i: (i, 0)),
            pl.BlockSpec((tm_eff, S), lambda i: (i, 0)),
            pl.BlockSpec((tm_eff, S), lambda i: (i, 0)),
        ),
        compiler_params=pltpu.CompilerParams(
            dimension_semantics=("parallel",),   # megacore row split on v7x
            vmem_limit_bytes=vmem_limit,
        ),
        cost_estimate=cost,
    )(x_k, w_fused, b_fused)

    if b_pad != B:
        msg, sig, qry = msg[:B], sig[:B], qry[:B]
    return msg, sig, qry


def _linear_init(key, fan_in, fan_out):
    """Deterministic init mimicking nn.Linear (uniform +-1/sqrt(fan_in)).

    Weights stored transposed: [in_features, out_features]; bias [1, out].
    """
    kw, kb = jax.random.split(key)
    bound = 1.0 / jnp.sqrt(fan_in)
    w = jax.random.uniform(kw, (fan_in, fan_out), jnp.float32, -bound, bound)
    b = jax.random.uniform(kb, (1, fan_out), jnp.float32, -bound, bound)
    return w, b


if __name__ == "__main__":
    # Synthetic hyperparameters (consistent with the module's __init__):
    n_agents = 2
    batch = 4
    input_shape = 16
    rnn_hidden_dim = 16
    comm_embed_dim = 16
    signature_dim = 8

    D = input_shape + rnn_hidden_dim          # linear in_features = 32
    B = batch * n_agents                      # flattened rows = 8

    root = jax.random.PRNGKey(0)
    k_in, k_v, k_s, k_q = jax.random.split(root, 4)

    inputs = jax.random.normal(k_in, (B, D), jnp.float32)
    wv, bv = _linear_init(k_v, D, comm_embed_dim)   # value head
    ws, bs = _linear_init(k_s, D, signature_dim)    # signature head
    wq, bq = _linear_init(k_q, D, signature_dim)    # query head

    # Plain-JAX f32 reference (matches the PyTorch module semantics).
    ref_msg = inputs @ wv + bv
    ref_sig = inputs @ ws + bs
    ref_qry = inputs @ wq + bq

    # 1) f32 compute path: tight numerical match to the module.
    w32, b32, E, S = prepare_tar_comm_params(
        wv, bv, ws, bs, wq, bq, compute_dtype=jnp.float32)
    fwd_f32 = jax.jit(functools.partial(tar_comm_forward, E=E, S=S))
    msg, sig, qry = fwd_f32(inputs, w32, b32)
    jax.block_until_ready((msg, sig, qry))
    assert msg.shape == (B, comm_embed_dim)
    assert sig.shape == (B, signature_dim)
    assert qry.shape == (B, signature_dim)
    assert jnp.allclose(msg, ref_msg, atol=1e-5)
    assert jnp.allclose(sig, ref_sig, atol=1e-5)
    assert jnp.allclose(qry, ref_qry, atol=1e-5)

    # 2) bf16 compute path (perf default): f32-accumulated bf16 matmul.
    wbf, bbf, E, S = prepare_tar_comm_params(
        wv, bv, ws, bs, wq, bq, compute_dtype=jnp.bfloat16)
    fwd_bf16 = jax.jit(functools.partial(tar_comm_forward, E=E, S=S))
    msg_b, sig_b, qry_b = fwd_bf16(inputs, wbf, bbf)
    jax.block_until_ready((msg_b, sig_b, qry_b))
    assert jnp.allclose(msg_b, ref_msg, atol=3e-2, rtol=3e-2)
    assert jnp.allclose(sig_b, ref_sig, atol=3e-2, rtol=3e-2)
    assert jnp.allclose(qry_b, ref_qry, atol=3e-2, rtol=3e-2)

    print("KERNEL_OK")
</pallas_src>

<mosaic_0001>
module attributes {stable_mosaic.version = 11 : i64} {
  func.func @tarcomm_fused_kernel(%arg0: i32, %arg1: memref<8x32xf32, #tpu.memory_space<vmem>>, %arg2: memref<32x32xf32, #tpu.memory_space<vmem>>, %arg3: memref<1x32xf32, #tpu.memory_space<vmem>>, %arg4: memref<8x16xf32, #tpu.memory_space<vmem>>, %arg5: memref<8x8xf32, #tpu.memory_space<vmem>>, %arg6: memref<8x8xf32, #tpu.memory_space<vmem>>) attributes {dimension_semantics = [#tpu.dimension_semantics<parallel>], iteration_bounds = array<i64: 1>, scalar_prefetch = 0 : i64, scratch_operands = 0 : i64, tpu.core_type = #tpu.core_type<tc>, window_params = [{transform_indices = @transform_0, window_bounds = array<i64: 8, 32>}, {pipeline_mode = #tpu.pipeline_mode<synchronous>, transform_indices = @transform_1, window_bounds = array<i64: 32, 32>}, {pipeline_mode = #tpu.pipeline_mode<synchronous>, transform_indices = @transform_2, window_bounds = array<i64: 1, 32>}, {transform_indices = @transform_3, window_bounds = array<i64: 8, 16>}, {transform_indices = @transform_4, window_bounds = array<i64: 8, 8>}, {transform_indices = @transform_5, window_bounds = array<i64: 8, 8>}]} {
    %c0 = arith.constant 0 : index
    %c0_0 = arith.constant 0 : index
    %0 = vector.load %arg1[%c0, %c0_0] : memref<8x32xf32, #tpu.memory_space<vmem>>, vector<8x32xf32>
    %c0_1 = arith.constant 0 : index
    %c0_2 = arith.constant 0 : index
    %1 = vector.load %arg2[%c0_1, %c0_2] : memref<32x32xf32, #tpu.memory_space<vmem>>, vector<32x32xf32>
    %cst = arith.constant dense<0.000000e+00> : vector<8x32xf32>
    %2 = tpu.matmul %0, %1, %cst {dimension_numbers = #tpu.dot_dimension_numbers<[1], [0], [0], [1], [0, 0, 1, 1], [], []>} : vector<8x32xf32>, vector<32x32xf32>, vector<8x32xf32> -> vector<8x32xf32>
    %c0_3 = arith.constant 0 : index
    %c0_4 = arith.constant 0 : index
    %3 = vector.load %arg3[%c0_3, %c0_4] : memref<1x32xf32, #tpu.memory_space<vmem>>, vector<1x32xf32>
    %4 = vector.broadcast %3 : vector<1x32xf32> to vector<8x32xf32>
    %5 = arith.addf %2, %4 : vector<8x32xf32>
    %6 = vector.extract_strided_slice %5 {offsets = [0, 0], sizes = [8, 16], strides = [1, 1]} : vector<8x32xf32> to vector<8x16xf32>
    %c0_5 = arith.constant 0 : index
    %c0_6 = arith.constant 0 : index
    %7 = vector.load %arg4[%c0_5, %c0_6] : memref<8x16xf32, #tpu.memory_space<vmem>>, vector<8x16xf32>
    tpu.vector_store %arg4[%c0_5, %c0_6], %6 {strides = array<i32>} : memref<8x16xf32, #tpu.memory_space<vmem>>, vector<8x16xf32>,
    %8 = vector.extract_strided_slice %5 {offsets = [0, 16], sizes = [8, 8], strides = [1, 1]} : vector<8x32xf32> to vector<8x8xf32>
    %c0_7 = arith.constant 0 : index
    %c0_8 = arith.constant 0 : index
    %9 = vector.load %arg5[%c0_7, %c0_8] : memref<8x8xf32, #tpu.memory_space<vmem>>, vector<8x8xf32>
    tpu.vector_store %arg5[%c0_7, %c0_8], %8 {strides = array<i32>} : memref<8x8xf32, #tpu.memory_space<vmem>>, vector<8x8xf32>,
    %10 = vector.extract_strided_slice %5 {offsets = [0, 24], sizes = [8, 8], strides = [1, 1]} : vector<8x32xf32> to vector<8x8xf32>
    %c0_9 = arith.constant 0 : index
    %c0_10 = arith.constant 0 : index
    %11 = vector.load %arg6[%c0_9, %c0_10] : memref<8x8xf32, #tpu.memory_space<vmem>>, vector<8x8xf32>
    tpu.vector_store %arg6[%c0_9, %c0_10], %10 {strides = array<i32>} : memref<8x8xf32, #tpu.memory_space<vmem>>, vector<8x8xf32>,
    return
  }
  func.func @transform_0(%arg0: i32) -> (i32, i32) {
    %c0_i32 = arith.constant 0 : i32
    %c0_i32_0 = arith.constant 0 : i32
    return %arg0, %c0_i32 : i32, i32
  }
  func.func @transform_1(%arg0: i32) -> (i32, i32) {
    %c0_i32 = arith.constant 0 : i32
    %c0_i32_0 = arith.constant 0 : i32
    %c0_i32_1 = arith.constant 0 : i32
    return %c0_i32, %c0_i32_0 : i32, i32
  }
  func.func @transform_2(%arg0: i32) -> (i32, i32) {
    %c0_i32 = arith.constant 0 : i32
    %c0_i32_0 = arith.constant 0 : i32
    %c0_i32_1 = arith.constant 0 : i32
    return %c0_i32, %c0_i32_0 : i32, i32
  }
  func.func @transform_3(%arg0: i32) -> (i32, i32) {
    %c0_i32 = arith.constant 0 : i32
    %c0_i32_0 = arith.constant 0 : i32
    return %arg0, %c0_i32 : i32, i32
  }
  func.func @transform_4(%arg0: i32) -> (i32, i32) {
    %c0_i32 = arith.constant 0 : i32
    %c0_i32_0 = arith.constant 0 : i32
    return %arg0, %c0_i32 : i32, i32
  }
  func.func @transform_5(%arg0: i32) -> (i32, i32) {
    %c0_i32 = arith.constant 0 : i32
    %c0_i32_0 = arith.constant 0 : i32
    return %arg0, %c0_i32 : i32, i32
  }
}

</mosaic_0001>

<bundles_post_ra>
// kernel: tar_comm_forward.1
= control target key start
LH: loop header
LB: loop body
LE: loop exit
PB: predicated region body
PF: predicated region fallthrough
CT: control target
= control target key end

     0   :  { %11 = vsyncpa [#allocation3], 0  ;;  %s454_s0 = inlined_call_operand.hbm [shape: f32[8,32], index: 0, kind: input, shape index: {}]   ;;  %s455_s1 = inlined_call_operand.hbm [shape: f32[32,32], index: 1, kind: input, shape index: {}]   ;;  %s456_s2 = inlined_call_operand.vmem [shape: f32[1,32], index: 2, kind: input, shape index: {}]   ;;  %s457_s3 = inlined_call_operand.hbm [shape: f32[8,16], index: 3, kind: output, shape index: {0}]   ;;  %s458_s4 = inlined_call_operand.hbm [shape: f32[8,8], index: 4, kind: output, shape index: {1}]   ;;  %s459_s5 = inlined_call_operand.hbm [shape: f32[8,8], index: 5, kind: output, shape index: {2}]  }
   0x1   :  { %12 = vsyncpa [#allocation6], 0 }
   0x2   :  { %13 = vsyncpa [#allocation4], 0 }
   0x3   :  { %14 = vsyncpa [#allocation9], 0  ;;  %s340_s18 = smov [#allocation2]   ;;  %s341_s20 = smov [#allocation5]  }
   0x4   :  { %s21_s19 = sshll.u32 %s340_s18, 4  ;;  %s30_s21 = sshll.u32 %s341_s20, 4  ;;  %s22_s19 = int_to_ptr.vmem [resolvable:$true] %s21_s19  ;;  %s382_s21 = int_to_ptr.vmem [resolvable:$true] %s30_s21 }
   0x5   :  { %s222_s24 = scalar_lea.hbm %s454_s0, 128 }
   0x6   :  { %p223_p0 = scmp.ne.s32.totalorder %s454_s0, %s222_s24  ;;  %p226_p1 = scmp.lt.u32.totalorder %s222_s24, %s454_s0 }
   0x8   :  { %p228_p2 = pnand %p226_p1, %p223_p0 }
   0xa   :  { %231 = shalt.err (!%p228_p2)
}
   0xb   :  { %s232_s29 = scalar_lea.vmem %s22_s19, 128  ;;  %p237_p4 = scmp.lt.s32.totalorder %s22_s19, %s22_s19 }
   0xc   :  { %p233_p3 = scmp.ne.s32.totalorder %s22_s19, %s232_s29  ;;  %p238_p5 = scmp.lt.s32.totalorder %s232_s29, %s232_s29 }
   0xe   :  { %p239_p6 = por %p238_p5, %p237_p4 }
  0x10   :  { %p240_p7 = pnand %p239_p6, %p233_p3 }
  0x12   :  { %243 = shalt.err (!%p240_p7)
}
  0x13   :  { %24 = dma.hbm_to_vmem [thread:$0]  %s454_s0, 128, %s22_s19, [#allocation3]  }
  0x14   :  { %s244_s9 = scalar_lea.hbm %s455_s1, 512 }
  0x15   :  { %p245_p8 = scmp.ne.s32.totalorder %s455_s1, %s244_s9  ;;  %p248_p9 = scmp.lt.u32.totalorder %s244_s9, %s455_s1 }
  0x17   :  { %p250_p10 = pnand %p248_p9, %p245_p8 }
  0x19   :  { %253 = shalt.err (!%p250_p10)
}
  0x1a   :  { %s254_s14 = scalar_lea.vmem %s382_s21, 512  ;;  %p259_p12 = scmp.lt.s32.totalorder %s382_s21, %s382_s21 }
  0x1b   :  { %p255_p11 = scmp.ne.s32.totalorder %s382_s21, %s254_s14  ;;  %p260_p13 = scmp.lt.s32.totalorder %s254_s14, %s254_s14 }
  0x1d   :  { %p261_p0 = por %p260_p13, %p259_p12 }
  0x1f   :  { %p262_p1 = pnand %p261_p0, %p255_p11 }
  0x21   :  { %265 = shalt.err (!%p262_p1)
}
  0x22   :  { %s342_s0 = smov 128   ;;  %s343_s15 = smov 8  }
  0x23   :  { %36 = dma.hbm_to_vmem [thread:$0]  %s455_s1, 512, %s382_s21, [#allocation6], %s342_s0, %s342_s0, %s343_s15  }
  0x24   :  { %332 = dma.done.wait [#allocation3], 128  }
  0x25   :  { %333 = vsyncadd [#allocation3], 4294967168 }
  0x26   :  { %334 = dma.done.wait [#allocation6], 512  }
  0x27   :  { %335 = vsyncadd [#allocation6], 4294966784  ;;  %v344_v0 = vmov 0.0|0.0   ;;  %vm345_vm0 = vmmov 0   ;;  %v346_v1 = vmov 0.0   ;;  %v46_v2 = vld [vmem:[#allocation5] sm:$0xff] }
  0x28   :  { %204 = vmatprep.subr.bf16.mxu0 %v344_v0  ;;  %201 = vmatprep.mubr.msk.f32.mxu0 %vm345_vm0, %v346_v1  ;;  %v47_v3 = vld [vmem:[#allocation5 + $0x8] sm:$0xff]  ;;  %v48_v4 = vld [vmem:[#allocation5 + $0x10] sm:$0xff]  ;;  %v49_v6 = vld [vmem:[#allocation5 + $0x18] sm:$0xff]  ;;  %vm57_vm1 = vcmask 261120   ;;  %s347_s19 = smov [#allocation7]   ;;  %vm131_vm2 = vcmask 130048  }
  0x29   :  { %v205_v5 = vpack.c.bf16 %v47_v3, %v46_v2  ;;  %v208_v7 = vpack.c.bf16 %v49_v6, %v48_v4  ;;  %v45_v8 = vld [vmem:[#allocation2] sm:$0xff]  ;;  %s149_s20 = sshll.u32 %s347_s19, 4  ;;  %s348_s21 = smov 112   ;;  %s150_s20 = int_to_ptr.vmem [resolvable:$true] %s149_s20 }
  0x2a   :  { %v186_v9 = vld [vmem:[%s456_s2] ss:$0 sm:$0xff]  ;;  %s266_s22 = scalar_lea.vmem %s150_s20, 128  ;;  %p271_p3 = scmp.lt.s32.totalorder %s150_s20, %s150_s20 }
  0x2b   :  { %206 = vmatpush3.bf16.msra.mxu0 %v205_v5  ;;  %p267_p2 = scmp.ne.s32.totalorder %s150_s20, %s266_s22  ;;  %p272_p4 = scmp.lt.s32.totalorder %s266_s22, %s266_s22 }
  0x2c   :  { %207 = vmatprep.subr.bf16.mxu0 %v344_v0 }
  0x2d   :  { %p273_p5 = por %p272_p4, %p271_p3 }
  0x2f   :  { %209 = vmatpush3.bf16.msra.mxu0 %v208_v7  ;;  %p274_p6 = pnand %p273_p5, %p267_p2 }
  0x32   :  { %202 = vmatmul.mubr.msk.f32.vlgmr.msra.gmra.mrb[0].mxu0 %vm57_vm1, %v45_v8 }
 0x105   :  { %v127_v10 = vpop.f32.mrb[0].mxu0 }
 0x106   :  { %v128_v11 = vadd.f32 %v186_v9, %v127_v10  ;;  %v203_v12 = vpop.f32.mrb[1].mxu0 }
 0x108   :  { %134 = vrot.lane.b32.xlu0 %v128_v11, %s348_s21  ;;  %132 = vst.msk [vmem:[#allocation7] sm:$0xff] %vm131_vm2, %v128_v11 }
 0x109   :  { %277 = shalt.err (!%p274_p6)
}
 0x10a   :  { %s278_s2 = scalar_lea.hbm %s457_s3, 128 }
 0x10b   :  { %p279_p7 = scmp.ne.s32.totalorder %s457_s3, %s278_s2  ;;  %p282_p8 = scmp.lt.u32.totalorder %s278_s2, %s457_s3 }
 0x10d   :  { %p284_p9 = pnand %p282_p8, %p279_p7 }
 0x10f   :  { %287 = shalt.err (!%p284_p9)
}
 0x110   :  { %152 = dma.vmem_to_hbm [thread:$0]  %s150_s20, 128, %s457_s3, [#allocation4]   ;;  %vm137_vm3 = vcmask 64512  }
 0x111   :  { %s349_s6 = smov 104   ;;  %s350_s7 = smov [#allocation8]  }
 0x112   :  { %139 = vrot.lane.b32.xlu0 %v128_v11, %s349_s6  ;;  %s159_s8 = sshll.u32 %s350_s7, 4  ;;  %s351_s9 = smov [#allocation10]   ;;  %s160_s8 = int_to_ptr.vmem [resolvable:$true] %s159_s8 }
 0x113   :  { %s169_s10 = sshll.u32 %s351_s9, 4  ;;  %s288_s11 = scalar_lea.vmem %s160_s8, 128  ;;  %s170_s10 = int_to_ptr.vmem [resolvable:$true] %s169_s10 }
 0x114   :  { %p289_p10 = scmp.ne.s32.totalorder %s160_s8, %s288_s11  ;;  %p293_p11 = scmp.lt.s32.totalorder %s160_s8, %s160_s8 }
 0x115   :  { %p294_p12 = scmp.lt.s32.totalorder %s288_s11, %s288_s11 }
 0x117   :  { %p295_p13 = por %p294_p12, %p293_p11 }
 0x119   :  { %p296_p0 = pnand %p295_p13, %p289_p10 }
 0x17a   :  { %v135_v13 = vpop.permute.xlu0 %134 }
 0x17b   :  { %138 = vst.msk [vmem:[#allocation8] sm:$0xff] %vm137_vm3, %v135_v13 }
 0x17c   :  { %299 = shalt.err (!%p296_p0)
}
 0x17d   :  { %s300_s13 = scalar_lea.hbm %s458_s4, 128 }
 0x17e   :  { %p301_p1 = scmp.ne.s32.totalorder %s458_s4, %s300_s13  ;;  %p304_p2 = scmp.lt.u32.totalorder %s300_s13, %s458_s4 }
 0x180   :  { %p306_p3 = pnand %p304_p2, %p301_p1 }
 0x182   :  { %309 = shalt.err (!%p306_p3)
}
 0x183   :  { %162 = dma.vmem_to_hbm [thread:$0]  %s160_s8, 128, %s458_s4, [#allocation9]  }
 0x184   :  { %v140_v14 = vpop.permute.xlu0 %139  ;;  %s310_s18 = scalar_lea.vmem %s170_s10, 128  ;;  %p315_p5 = scmp.lt.s32.totalorder %s170_s10, %s170_s10 }
 0x185   :  { %142 = vst.msk [vmem:[#allocation10] sm:$0xff] %vm137_vm3, %v140_v14  ;;  %p311_p4 = scmp.ne.s32.totalorder %s170_s10, %s310_s18  ;;  %p316_p6 = scmp.lt.s32.totalorder %s310_s18, %s310_s18 }
 0x187   :  { %p317_p7 = por %p316_p6, %p315_p5 }
 0x189   :  { %p318_p8 = pnand %p317_p7, %p311_p4 }
 0x18b   :  { %321 = shalt.err (!%p318_p8)
}
 0x18c   :  { %s322_s21 = scalar_lea.hbm %s459_s5, 128 }
 0x18d   :  { %p323_p9 = scmp.ne.s32.totalorder %s459_s5, %s322_s21  ;;  %p326_p10 = scmp.lt.u32.totalorder %s322_s21, %s459_s5 }
 0x18f   :  { %p328_p11 = pnand %p326_p10, %p323_p9 }
 0x191   :  { %331 = shalt.err (!%p328_p11)
}
 0x192   :  { %172 = dma.vmem_to_hbm [thread:$0]  %s170_s10, 128, %s459_s5, [#allocation9]  }
 0x193   :  { %336 = dma.done.wait [#allocation4], 128  }
 0x194   :  { %337 = vsyncadd [#allocation4], 4294967168 }
 0x195   :  { %338 = dma.done.wait [#allocation9], 256  }
 0x196   :  { %339 = vsyncadd [#allocation9], 4294967040 }
 0x197   :  { %182 = vsyncpa [#allocation3], 1 }
 0x198   :  { %183 = vsyncpa [#allocation6], 1 }
 0x199   :  { %184 = vsyncpa [#allocation4], 1 }
 0x19a   :  { %185 = vsyncpa [#allocation9], 1 }

</bundles_post_ra>
